<compile_context>
chip_gen: v7x
topology: tpu7x:2x2x1
jax: 0.10.0
libtpu: 0.0.40
codegen_flags: <defaults>
</compile_context>

<pallas_src>
import math
import functools

import jax
import jax.numpy as jnp
from jax import lax
from jax.experimental import pallas as pl
from jax.experimental.pallas import tpu as pltpu


def _attn_kernel(q_ref, w_ref, b_ref, k_ref, v_ref, mask_ref, o_ref, *, inv_scale):
    # q_ref:    (Bb, Sq, D)    queries for this batch block
    # w_ref:    (D, D)         Linear weight, PyTorch (out, in) layout (untransposed)
    # b_ref:    (1, D)         Linear bias
    # k_ref:    (Bb, Sk, Sq)   keys  (Sq == D required by the module's matmul chain)
    # v_ref:    (Bb, Sk, Dv)   values
    # mask_ref: (Bb, Sk, D)    additive mask (f32 {0,1}), pre-transposed per batch
    # o_ref:    (Bb, D, Dv)    natural output layout, written per batch slice
    bb = k_ref.shape[0]

    w = w_ref[...]        # (D, D)  resident across grid steps (constant index_map)
    bias = b_ref[...]     # (1, D)

    # Static unroll over the (tiny) batch block; every temporary stays per-batch,
    # no concatenates, no explicit transposes.
    for bi in range(bb):
        k_b = k_ref[bi]                                               # (Sk, Sq)
        # ---- Reordered matmul chain (algebraically == the PyTorch order) ----
        # PyTorch: scores   = (q @ W^T + b)^T @ k^T / sqrt(D)             -> (D, Sk)
        # Here:    scores^T = ((k @ q) @ W^T + rowsum(k) * b) / sqrt(D)   -> (Sk, D)
        t = jnp.dot(k_b, q_ref[bi],
                    preferred_element_type=jnp.float32)               # (Sk, D)
        u = lax.dot_general(t, w, (((1,), (1,)), ((), ())),
                            preferred_element_type=jnp.float32)       # (Sk, D)
        ksum = jnp.sum(k_b, axis=-1, keepdims=True)                   # (Sk, 1)
        s = (u + ksum * bias) * inv_scale + mask_ref[bi]              # (Sk, D)

        # Softmax over the key axis (rows of the transposed score block).
        m = jnp.max(s, axis=0, keepdims=True)                         # (1, D)
        p = jnp.exp(s - m)                                            # (Sk, D)
        denom = jnp.sum(p, axis=0, keepdims=True)                     # (1, D)
        # Exact reciprocal: approx=True (~1e-3 rel. error) could exceed the
        # tolerance we validate against.
        probs_t = p * pl.reciprocal(denom, approx=False)              # (Sk, D)

        # Contract the key axis directly (dim 0 of both operands); no explicit
        # transpose of the probability block.
        out = lax.dot_general(probs_t, v_ref[bi], (((0,), (0,)), ((), ())),
                              preferred_element_type=jnp.float32)     # (D, Dv)
        o_ref[bi] = out


@functools.lru_cache(maxsize=None)
def _num_tensorcores():
    """Device-aware TensorCore count; safe fallback to 1 (single grid step)."""
    try:
        info = pltpu.get_tpu_info()
    except Exception:
        return 1
    for attr in ("num_cores", "core_count", "num_tensorcores",
                 "tensorcores_per_chip", "cores_per_chip"):
        n = getattr(info, attr, None)
        if isinstance(n, int) and n > 0:
            return n
    return 1


@jax.jit
def model_forward(q, w, b, k, v, mask):
    """q:(B,Sq,D) f32, w:(D,D) PyTorch (out,in), b:(D,), k:(B,Sk,Sq), v:(B,Sk,Dv),
    mask: bool, broadcast-compatible with (B, D, Sk) (as in the PyTorch module)."""
    B, Sq, D = q.shape
    _, Sk, Dk = k.shape
    Dv = v.shape[-1]
    assert Dk == Sq, "forward as written requires q.shape[-2] == k.shape[-1]"

    # One grid step per TensorCore when the batch divides evenly; otherwise a
    # single step (this kernel is overhead-bound, extra steps only add cost).
    ncores = _num_tensorcores()
    G = ncores if (ncores > 1 and B % ncores == 0) else 1
    Bb = B // G

    b2 = b.reshape(1, D)
    # Mask as f32 in the transposed (Sk, D) per-batch layout the kernel uses.
    # This prep fuses into the same jitted program as the pallas_call.
    mask_t = jnp.swapaxes(jnp.broadcast_to(mask, (B, D, Sk)), -1, -2).astype(jnp.float32)

    kernel = functools.partial(_attn_kernel, inv_scale=1.0 / math.sqrt(D))

    flops = 2 * B * (Sk * Sq * D + Sk * D * D + D * Sk * Dv)
    bytes_accessed = 4 * (q.size + w.size + b2.size + k.size + v.size
                          + mask_t.size + B * D * Dv)

    out = pl.pallas_call(
        kernel,
        out_shape=jax.ShapeDtypeStruct((B, D, Dv), jnp.float32),
        grid_spec=pltpu.PrefetchScalarGridSpec(
            num_scalar_prefetch=0,
            grid=(G,),
            in_specs=[
                pl.BlockSpec((Bb, Sq, D), lambda g: (g, 0, 0)),    # q
                pl.BlockSpec((D, D), lambda g: (0, 0)),            # w (resident)
                pl.BlockSpec((1, D), lambda g: (0, 0)),            # bias (resident)
                pl.BlockSpec((Bb, Sk, Dk), lambda g: (g, 0, 0)),   # k
                pl.BlockSpec((Bb, Sk, Dv), lambda g: (g, 0, 0)),   # v
                pl.BlockSpec((Bb, Sk, D), lambda g: (g, 0, 0)),    # mask^T (f32)
            ],
            out_specs=pl.BlockSpec((Bb, D, Dv), lambda g: (g, 0, 0)),
        ),
        compiler_params=pltpu.CompilerParams(
            dimension_semantics=("parallel",),
        ),
        cost_estimate=pl.CostEstimate(
            flops=flops, transcendentals=B * Sk * D, bytes_accessed=bytes_accessed),
    )(q, w, b2, k, v, mask_t)

    return (out,)


def _reference(q, w, b, k, v, mask):
    D = q.shape[-1]
    lin = jnp.einsum("bsd,od->bso", q, w) + b
    v1 = jnp.swapaxes(lin, -2, -1) / math.sqrt(D)      # (B, D, Sq)
    v2 = jnp.einsum("bds,bks->bdk", v1, k)             # (B, D, Sk)
    v3 = v2 + mask.astype(jnp.float32)
    v4 = jax.nn.softmax(v3, axis=-1)
    return jnp.einsum("bdk,bkv->bdv", v4, v).astype(jnp.float32)


if __name__ == "__main__":
    # Linear(64, 64) forces D = 64; the module's transpose+matmul forces Sq = D = 64.
    B, Sq, D, Sk, Dv = 4, 64, 64, 8, 64

    key = jax.random.PRNGKey(0)
    kq, kk, kv, kw, kb = jax.random.split(key, 5)

    q = jax.random.normal(kq, (B, Sq, D), dtype=jnp.float32)
    k = jax.random.normal(kk, (B, Sk, Sq), dtype=jnp.float32)   # k.shape[-1] == Sq
    v = jax.random.normal(kv, (B, Sk, Dv), dtype=jnp.float32)
    # mask = torch.ones(...).eq(0)  -> all-False bool (added as {0,1}, NOT -inf
    # masking, to stay faithful to the PyTorch op).
    mask = (jnp.ones((B, D, Sk)) == 0)

    # Deterministic Linear(64, 64) params (PyTorch-style (out, in) weight).
    bound = 1.0 / math.sqrt(D)
    w = jax.random.uniform(kw, (D, D), minval=-bound, maxval=bound, dtype=jnp.float32)
    b = jax.random.uniform(kb, (D,), minval=-bound, maxval=bound, dtype=jnp.float32)

    (out,) = model_forward(q, w, b, k, v, mask)
    out = jax.block_until_ready(out)

    ref = _reference(q, w, b, k, v, mask)
    assert out.shape == (B, D, Dv) and out.dtype == jnp.float32
    # The algebraic reorder ((k@q)@W^T vs k@(q@W^T)) changes rounding slightly.
    assert jnp.allclose(out, ref, atol=5e-4, rtol=5e-4)

    print("KERNEL_OK")
</pallas_src>

<mosaic_0001>
module attributes {stable_mosaic.version = 11 : i64} {
  func.func @_attn_kernel(%arg0: i32, %arg1: memref<4x64x64xf32, #tpu.memory_space<vmem>>, %arg2: memref<64x64xf32, #tpu.memory_space<vmem>>, %arg3: memref<1x64xf32, #tpu.memory_space<vmem>>, %arg4: memref<4x8x64xf32, #tpu.memory_space<vmem>>, %arg5: memref<4x8x64xf32, #tpu.memory_space<vmem>>, %arg6: memref<4x8x64xf32, #tpu.memory_space<vmem>>, %arg7: memref<4x64x64xf32, #tpu.memory_space<vmem>>) attributes {dimension_semantics = [#tpu.dimension_semantics<parallel>], iteration_bounds = array<i64: 1>, scalar_prefetch = 0 : i64, scratch_operands = 0 : i64, tpu.core_type = #tpu.core_type<tc>, window_params = [{transform_indices = @transform_0, window_bounds = array<i64: 4, 64, 64>}, {pipeline_mode = #tpu.pipeline_mode<synchronous>, transform_indices = @transform_1, window_bounds = array<i64: 64, 64>}, {pipeline_mode = #tpu.pipeline_mode<synchronous>, transform_indices = @transform_2, window_bounds = array<i64: 1, 64>}, {transform_indices = @transform_3, window_bounds = array<i64: 4, 8, 64>}, {transform_indices = @transform_4, window_bounds = array<i64: 4, 8, 64>}, {transform_indices = @transform_5, window_bounds = array<i64: 4, 8, 64>}, {transform_indices = @transform_6, window_bounds = array<i64: 4, 64, 64>}]} {
    %c0 = arith.constant 0 : index
    %c0_0 = arith.constant 0 : index
    %0 = vector.load %arg2[%c0, %c0_0] : memref<64x64xf32, #tpu.memory_space<vmem>>, vector<64x64xf32>
    %c0_1 = arith.constant 0 : index
    %c0_2 = arith.constant 0 : index
    %1 = vector.load %arg3[%c0_1, %c0_2] : memref<1x64xf32, #tpu.memory_space<vmem>>, vector<1x64xf32>
    %c0_3 = arith.constant 0 : index
    %c0_4 = arith.constant 0 : index
    %c0_5 = arith.constant 0 : index
    %2 = vector.load %arg4[%c0_3, %c0_4, %c0_5] : memref<4x8x64xf32, #tpu.memory_space<vmem>>, vector<1x8x64xf32>
    %3 = vector.shape_cast %2 : vector<1x8x64xf32> to vector<8x64xf32>
    %c0_6 = arith.constant 0 : index
    %c0_7 = arith.constant 0 : index
    %c0_8 = arith.constant 0 : index
    %4 = vector.load %arg1[%c0_6, %c0_7, %c0_8] : memref<4x64x64xf32, #tpu.memory_space<vmem>>, vector<1x64x64xf32>
    %5 = vector.shape_cast %4 : vector<1x64x64xf32> to vector<64x64xf32>
    %cst = arith.constant dense<0.000000e+00> : vector<8x64xf32>
    %6 = tpu.matmul %3, %5, %cst {dimension_numbers = #tpu.dot_dimension_numbers<[1], [0], [0], [1], [0, 0, 1, 1], [], []>} : vector<8x64xf32>, vector<64x64xf32>, vector<8x64xf32> -> vector<8x64xf32>
    %cst_9 = arith.constant dense<0.000000e+00> : vector<8x64xf32>
    %7 = tpu.matmul %6, %0, %cst_9 {dimension_numbers = #tpu.dot_dimension_numbers<[1], [1], [0], [0], [0, 0, 1, 0], [], []>} : vector<8x64xf32>, vector<64x64xf32>, vector<8x64xf32> -> vector<8x64xf32>
    %cst_10 = arith.constant dense<0.000000e+00> : vector<8xf32>
    %8 = vector.multi_reduction <add>, %3, %cst_10 [1] : vector<8x64xf32> to vector<8xf32>
    %9 = vector.shape_cast %8 : vector<8xf32> to vector<8x1xf32>
    %10 = vector.broadcast %9 : vector<8x1xf32> to vector<8x64xf32>
    %11 = vector.broadcast %1 : vector<1x64xf32> to vector<8x64xf32>
    %12 = arith.mulf %10, %11 : vector<8x64xf32>
    %13 = arith.addf %7, %12 : vector<8x64xf32>
    %cst_11 = arith.constant 1.250000e-01 : f32
    %14 = vector.broadcast %cst_11 : f32 to vector<8x64xf32>
    %15 = arith.mulf %13, %14 : vector<8x64xf32>
    %c0_12 = arith.constant 0 : index
    %c0_13 = arith.constant 0 : index
    %c0_14 = arith.constant 0 : index
    %16 = vector.load %arg6[%c0_12, %c0_13, %c0_14] : memref<4x8x64xf32, #tpu.memory_space<vmem>>, vector<1x8x64xf32>
    %17 = vector.shape_cast %16 : vector<1x8x64xf32> to vector<8x64xf32>
    %18 = arith.addf %15, %17 : vector<8x64xf32>
    %cst_15 = arith.constant dense<0xFF800000> : vector<64xf32>
    %19 = vector.multi_reduction <maximumf>, %18, %cst_15 [0] : vector<8x64xf32> to vector<64xf32>
    %20 = vector.shape_cast %19 : vector<64xf32> to vector<1x64xf32>
    %21 = vector.broadcast %20 : vector<1x64xf32> to vector<8x64xf32>
    %22 = arith.subf %18, %21 : vector<8x64xf32>
    %23 = math.exp %22 : vector<8x64xf32>
    %cst_16 = arith.constant dense<0.000000e+00> : vector<64xf32>
    %24 = vector.multi_reduction <add>, %23, %cst_16 [0] : vector<8x64xf32> to vector<64xf32>
    %25 = vector.shape_cast %24 : vector<64xf32> to vector<1x64xf32>
    %26 = tpu.reciprocal %25 : vector<1x64xf32> -> vector<1x64xf32>
    %27 = vector.broadcast %26 : vector<1x64xf32> to vector<8x64xf32>
    %28 = arith.mulf %23, %27 : vector<8x64xf32>
    %c0_17 = arith.constant 0 : index
    %c0_18 = arith.constant 0 : index
    %c0_19 = arith.constant 0 : index
    %29 = vector.load %arg5[%c0_17, %c0_18, %c0_19] : memref<4x8x64xf32, #tpu.memory_space<vmem>>, vector<1x8x64xf32>
    %30 = vector.shape_cast %29 : vector<1x8x64xf32> to vector<8x64xf32>
    %cst_20 = arith.constant dense<0.000000e+00> : vector<64x64xf32>
    %31 = tpu.matmul %28, %30, %cst_20 {dimension_numbers = #tpu.dot_dimension_numbers<[0], [0], [1], [1], [0, 1, 1, 1], [], []>} : vector<8x64xf32>, vector<8x64xf32>, vector<64x64xf32> -> vector<64x64xf32>
    %c0_21 = arith.constant 0 : index
    %c0_22 = arith.constant 0 : index
    %c0_23 = arith.constant 0 : index
    %32 = vector.load %arg7[%c0_21, %c0_22, %c0_23] : memref<4x64x64xf32, #tpu.memory_space<vmem>>, vector<1x64x64xf32>
    %33 = vector.shape_cast %32 : vector<1x64x64xf32> to vector<64x64xf32>
    %34 = vector.shape_cast %31 : vector<64x64xf32> to vector<1x64x64xf32>
    tpu.vector_store %arg7[%c0_21, %c0_22, %c0_23], %34 {strides = array<i32>} : memref<4x64x64xf32, #tpu.memory_space<vmem>>, vector<1x64x64xf32>,
    %c1 = arith.constant 1 : index
    %c0_24 = arith.constant 0 : index
    %c0_25 = arith.constant 0 : index
    %35 = vector.load %arg4[%c1, %c0_24, %c0_25] : memref<4x8x64xf32, #tpu.memory_space<vmem>>, vector<1x8x64xf32>
    %36 = vector.shape_cast %35 : vector<1x8x64xf32> to vector<8x64xf32>
    %c1_26 = arith.constant 1 : index
    %c0_27 = arith.constant 0 : index
    %c0_28 = arith.constant 0 : index
    %37 = vector.load %arg1[%c1_26, %c0_27, %c0_28] : memref<4x64x64xf32, #tpu.memory_space<vmem>>, vector<1x64x64xf32>
    %38 = vector.shape_cast %37 : vector<1x64x64xf32> to vector<64x64xf32>
    %cst_29 = arith.constant dense<0.000000e+00> : vector<8x64xf32>
    %39 = tpu.matmul %36, %38, %cst_29 {dimension_numbers = #tpu.dot_dimension_numbers<[1], [0], [0], [1], [0, 0, 1, 1], [], []>} : vector<8x64xf32>, vector<64x64xf32>, vector<8x64xf32> -> vector<8x64xf32>
    %cst_30 = arith.constant dense<0.000000e+00> : vector<8x64xf32>
    %40 = tpu.matmul %39, %0, %cst_30 {dimension_numbers = #tpu.dot_dimension_numbers<[1], [1], [0], [0], [0, 0, 1, 0], [], []>} : vector<8x64xf32>, vector<64x64xf32>, vector<8x64xf32> -> vector<8x64xf32>
    %cst_31 = arith.constant dense<0.000000e+00> : vector<8xf32>
    %41 = vector.multi_reduction <add>, %36, %cst_31 [1] : vector<8x64xf32> to vector<8xf32>
    %42 = vector.shape_cast %41 : vector<8xf32> to vector<8x1xf32>
    %43 = vector.broadcast %42 : vector<8x1xf32> to vector<8x64xf32>
    %44 = vector.broadcast %1 : vector<1x64xf32> to vector<8x64xf32>
    %45 = arith.mulf %43, %44 : vector<8x64xf32>
    %46 = arith.addf %40, %45 : vector<8x64xf32>
    %cst_32 = arith.constant 1.250000e-01 : f32
    %47 = vector.broadcast %cst_32 : f32 to vector<8x64xf32>
    %48 = arith.mulf %46, %47 : vector<8x64xf32>
    %c1_33 = arith.constant 1 : index
    %c0_34 = arith.constant 0 : index
    %c0_35 = arith.constant 0 : index
    %49 = vector.load %arg6[%c1_33, %c0_34, %c0_35] : memref<4x8x64xf32, #tpu.memory_space<vmem>>, vector<1x8x64xf32>
    %50 = vector.shape_cast %49 : vector<1x8x64xf32> to vector<8x64xf32>
    %51 = arith.addf %48, %50 : vector<8x64xf32>
    %cst_36 = arith.constant dense<0xFF800000> : vector<64xf32>
    %52 = vector.multi_reduction <maximumf>, %51, %cst_36 [0] : vector<8x64xf32> to vector<64xf32>
    %53 = vector.shape_cast %52 : vector<64xf32> to vector<1x64xf32>
    %54 = vector.broadcast %53 : vector<1x64xf32> to vector<8x64xf32>
    %55 = arith.subf %51, %54 : vector<8x64xf32>
    %56 = math.exp %55 : vector<8x64xf32>
    %cst_37 = arith.constant dense<0.000000e+00> : vector<64xf32>
    %57 = vector.multi_reduction <add>, %56, %cst_37 [0] : vector<8x64xf32> to vector<64xf32>
    %58 = vector.shape_cast %57 : vector<64xf32> to vector<1x64xf32>
    %59 = tpu.reciprocal %58 : vector<1x64xf32> -> vector<1x64xf32>
    %60 = vector.broadcast %59 : vector<1x64xf32> to vector<8x64xf32>
    %61 = arith.mulf %56, %60 : vector<8x64xf32>
    %c1_38 = arith.constant 1 : index
    %c0_39 = arith.constant 0 : index
    %c0_40 = arith.constant 0 : index
    %62 = vector.load %arg5[%c1_38, %c0_39, %c0_40] : memref<4x8x64xf32, #tpu.memory_space<vmem>>, vector<1x8x64xf32>
    %63 = vector.shape_cast %62 : vector<1x8x64xf32> to vector<8x64xf32>
    %cst_41 = arith.constant dense<0.000000e+00> : vector<64x64xf32>
    %64 = tpu.matmul %61, %63, %cst_41 {dimension_numbers = #tpu.dot_dimension_numbers<[0], [0], [1], [1], [0, 1, 1, 1], [], []>} : vector<8x64xf32>, vector<8x64xf32>, vector<64x64xf32> -> vector<64x64xf32>
    %c1_42 = arith.constant 1 : index
    %c0_43 = arith.constant 0 : index
    %c0_44 = arith.constant 0 : index
    %65 = vector.load %arg7[%c1_42, %c0_43, %c0_44] : memref<4x64x64xf32, #tpu.memory_space<vmem>>, vector<1x64x64xf32>
    %66 = vector.shape_cast %65 : vector<1x64x64xf32> to vector<64x64xf32>
    %67 = vector.shape_cast %64 : vector<64x64xf32> to vector<1x64x64xf32>
    tpu.vector_store %arg7[%c1_42, %c0_43, %c0_44], %67 {strides = array<i32>} : memref<4x64x64xf32, #tpu.memory_space<vmem>>, vector<1x64x64xf32>,
    %c2 = arith.constant 2 : index
    %c0_45 = arith.constant 0 : index
    %c0_46 = arith.constant 0 : index
    %68 = vector.load %arg4[%c2, %c0_45, %c0_46] : memref<4x8x64xf32, #tpu.memory_space<vmem>>, vector<1x8x64xf32>
    %69 = vector.shape_cast %68 : vector<1x8x64xf32> to vector<8x64xf32>
    %c2_47 = arith.constant 2 : index
    %c0_48 = arith.constant 0 : index
    %c0_49 = arith.constant 0 : index
    %70 = vector.load %arg1[%c2_47, %c0_48, %c0_49] : memref<4x64x64xf32, #tpu.memory_space<vmem>>, vector<1x64x64xf32>
    %71 = vector.shape_cast %70 : vector<1x64x64xf32> to vector<64x64xf32>
    %cst_50 = arith.constant dense<0.000000e+00> : vector<8x64xf32>
    %72 = tpu.matmul %69, %71, %cst_50 {dimension_numbers = #tpu.dot_dimension_numbers<[1], [0], [0], [1], [0, 0, 1, 1], [], []>} : vector<8x64xf32>, vector<64x64xf32>, vector<8x64xf32> -> vector<8x64xf32>
    %cst_51 = arith.constant dense<0.000000e+00> : vector<8x64xf32>
    %73 = tpu.matmul %72, %0, %cst_51 {dimension_numbers = #tpu.dot_dimension_numbers<[1], [1], [0], [0], [0, 0, 1, 0], [], []>} : vector<8x64xf32>, vector<64x64xf32>, vector<8x64xf32> -> vector<8x64xf32>
    %cst_52 = arith.constant dense<0.000000e+00> : vector<8xf32>
    %74 = vector.multi_reduction <add>, %69, %cst_52 [1] : vector<8x64xf32> to vector<8xf32>
    %75 = vector.shape_cast %74 : vector<8xf32> to vector<8x1xf32>
    %76 = vector.broadcast %75 : vector<8x1xf32> to vector<8x64xf32>
    %77 = vector.broadcast %1 : vector<1x64xf32> to vector<8x64xf32>
    %78 = arith.mulf %76, %77 : vector<8x64xf32>
    %79 = arith.addf %73, %78 : vector<8x64xf32>
    %cst_53 = arith.constant 1.250000e-01 : f32
    %80 = vector.broadcast %cst_53 : f32 to vector<8x64xf32>
    %81 = arith.mulf %79, %80 : vector<8x64xf32>
    %c2_54 = arith.constant 2 : index
    %c0_55 = arith.constant 0 : index
    %c0_56 = arith.constant 0 : index
    %82 = vector.load %arg6[%c2_54, %c0_55, %c0_56] : memref<4x8x64xf32, #tpu.memory_space<vmem>>, vector<1x8x64xf32>
    %83 = vector.shape_cast %82 : vector<1x8x64xf32> to vector<8x64xf32>
    %84 = arith.addf %81, %83 : vector<8x64xf32>
    %cst_57 = arith.constant dense<0xFF800000> : vector<64xf32>
    %85 = vector.multi_reduction <maximumf>, %84, %cst_57 [0] : vector<8x64xf32> to vector<64xf32>
    %86 = vector.shape_cast %85 : vector<64xf32> to vector<1x64xf32>
    %87 = vector.broadcast %86 : vector<1x64xf32> to vector<8x64xf32>
    %88 = arith.subf %84, %87 : vector<8x64xf32>
    %89 = math.exp %88 : vector<8x64xf32>
    %cst_58 = arith.constant dense<0.000000e+00> : vector<64xf32>
    %90 = vector.multi_reduction <add>, %89, %cst_58 [0] : vector<8x64xf32> to vector<64xf32>
    %91 = vector.shape_cast %90 : vector<64xf32> to vector<1x64xf32>
    %92 = tpu.reciprocal %91 : vector<1x64xf32> -> vector<1x64xf32>
    %93 = vector.broadcast %92 : vector<1x64xf32> to vector<8x64xf32>
    %94 = arith.mulf %89, %93 : vector<8x64xf32>
    %c2_59 = arith.constant 2 : index
    %c0_60 = arith.constant 0 : index
    %c0_61 = arith.constant 0 : index
    %95 = vector.load %arg5[%c2_59, %c0_60, %c0_61] : memref<4x8x64xf32, #tpu.memory_space<vmem>>, vector<1x8x64xf32>
    %96 = vector.shape_cast %95 : vector<1x8x64xf32> to vector<8x64xf32>
    %cst_62 = arith.constant dense<0.000000e+00> : vector<64x64xf32>
    %97 = tpu.matmul %94, %96, %cst_62 {dimension_numbers = #tpu.dot_dimension_numbers<[0], [0], [1], [1], [0, 1, 1, 1], [], []>} : vector<8x64xf32>, vector<8x64xf32>, vector<64x64xf32> -> vector<64x64xf32>
    %c2_63 = arith.constant 2 : index
    %c0_64 = arith.constant 0 : index
    %c0_65 = arith.constant 0 : index
    %98 = vector.load %arg7[%c2_63, %c0_64, %c0_65] : memref<4x64x64xf32, #tpu.memory_space<vmem>>, vector<1x64x64xf32>
    %99 = vector.shape_cast %98 : vector<1x64x64xf32> to vector<64x64xf32>
    %100 = vector.shape_cast %97 : vector<64x64xf32> to vector<1x64x64xf32>
    tpu.vector_store %arg7[%c2_63, %c0_64, %c0_65], %100 {strides = array<i32>} : memref<4x64x64xf32, #tpu.memory_space<vmem>>, vector<1x64x64xf32>,
    %c3 = arith.constant 3 : index
    %c0_66 = arith.constant 0 : index
    %c0_67 = arith.constant 0 : index
    %101 = vector.load %arg4[%c3, %c0_66, %c0_67] : memref<4x8x64xf32, #tpu.memory_space<vmem>>, vector<1x8x64xf32>
    %102 = vector.shape_cast %101 : vector<1x8x64xf32> to vector<8x64xf32>
    %c3_68 = arith.constant 3 : index
    %c0_69 = arith.constant 0 : index
    %c0_70 = arith.constant 0 : index
    %103 = vector.load %arg1[%c3_68, %c0_69, %c0_70] : memref<4x64x64xf32, #tpu.memory_space<vmem>>, vector<1x64x64xf32>
    %104 = vector.shape_cast %103 : vector<1x64x64xf32> to vector<64x64xf32>
    %cst_71 = arith.constant dense<0.000000e+00> : vector<8x64xf32>
    %105 = tpu.matmul %102, %104, %cst_71 {dimension_numbers = #tpu.dot_dimension_numbers<[1], [0], [0], [1], [0, 0, 1, 1], [], []>} : vector<8x64xf32>, vector<64x64xf32>, vector<8x64xf32> -> vector<8x64xf32>
    %cst_72 = arith.constant dense<0.000000e+00> : vector<8x64xf32>
    %106 = tpu.matmul %105, %0, %cst_72 {dimension_numbers = #tpu.dot_dimension_numbers<[1], [1], [0], [0], [0, 0, 1, 0], [], []>} : vector<8x64xf32>, vector<64x64xf32>, vector<8x64xf32> -> vector<8x64xf32>
    %cst_73 = arith.constant dense<0.000000e+00> : vector<8xf32>
    %107 = vector.multi_reduction <add>, %102, %cst_73 [1] : vector<8x64xf32> to vector<8xf32>
    %108 = vector.shape_cast %107 : vector<8xf32> to vector<8x1xf32>
    %109 = vector.broadcast %108 : vector<8x1xf32> to vector<8x64xf32>
    %110 = vector.broadcast %1 : vector<1x64xf32> to vector<8x64xf32>
    %111 = arith.mulf %109, %110 : vector<8x64xf32>
    %112 = arith.addf %106, %111 : vector<8x64xf32>
    %cst_74 = arith.constant 1.250000e-01 : f32
    %113 = vector.broadcast %cst_74 : f32 to vector<8x64xf32>
    %114 = arith.mulf %112, %113 : vector<8x64xf32>
    %c3_75 = arith.constant 3 : index
    %c0_76 = arith.constant 0 : index
    %c0_77 = arith.constant 0 : index
    %115 = vector.load %arg6[%c3_75, %c0_76, %c0_77] : memref<4x8x64xf32, #tpu.memory_space<vmem>>, vector<1x8x64xf32>
    %116 = vector.shape_cast %115 : vector<1x8x64xf32> to vector<8x64xf32>
    %117 = arith.addf %114, %116 : vector<8x64xf32>
    %cst_78 = arith.constant dense<0xFF800000> : vector<64xf32>
    %118 = vector.multi_reduction <maximumf>, %117, %cst_78 [0] : vector<8x64xf32> to vector<64xf32>
    %119 = vector.shape_cast %118 : vector<64xf32> to vector<1x64xf32>
    %120 = vector.broadcast %119 : vector<1x64xf32> to vector<8x64xf32>
    %121 = arith.subf %117, %120 : vector<8x64xf32>
    %122 = math.exp %121 : vector<8x64xf32>
    %cst_79 = arith.constant dense<0.000000e+00> : vector<64xf32>
    %123 = vector.multi_reduction <add>, %122, %cst_79 [0] : vector<8x64xf32> to vector<64xf32>
    %124 = vector.shape_cast %123 : vector<64xf32> to vector<1x64xf32>
    %125 = tpu.reciprocal %124 : vector<1x64xf32> -> vector<1x64xf32>
    %126 = vector.broadcast %125 : vector<1x64xf32> to vector<8x64xf32>
    %127 = arith.mulf %122, %126 : vector<8x64xf32>
    %c3_80 = arith.constant 3 : index
    %c0_81 = arith.constant 0 : index
    %c0_82 = arith.constant 0 : index
    %128 = vector.load %arg5[%c3_80, %c0_81, %c0_82] : memref<4x8x64xf32, #tpu.memory_space<vmem>>, vector<1x8x64xf32>
    %129 = vector.shape_cast %128 : vector<1x8x64xf32> to vector<8x64xf32>
    %cst_83 = arith.constant dense<0.000000e+00> : vector<64x64xf32>
    %130 = tpu.matmul %127, %129, %cst_83 {dimension_numbers = #tpu.dot_dimension_numbers<[0], [0], [1], [1], [0, 1, 1, 1], [], []>} : vector<8x64xf32>, vector<8x64xf32>, vector<64x64xf32> -> vector<64x64xf32>
    %c3_84 = arith.constant 3 : index
    %c0_85 = arith.constant 0 : index
    %c0_86 = arith.constant 0 : index
    %131 = vector.load %arg7[%c3_84, %c0_85, %c0_86] : memref<4x64x64xf32, #tpu.memory_space<vmem>>, vector<1x64x64xf32>
    %132 = vector.shape_cast %131 : vector<1x64x64xf32> to vector<64x64xf32>
    %133 = vector.shape_cast %130 : vector<64x64xf32> to vector<1x64x64xf32>
    tpu.vector_store %arg7[%c3_84, %c0_85, %c0_86], %133 {strides = array<i32>} : memref<4x64x64xf32, #tpu.memory_space<vmem>>, vector<1x64x64xf32>,
    return
  }
  func.func @transform_0(%arg0: i32) -> (i32, i32, i32) {
    %c0_i32 = arith.constant 0 : i32
    %c0_i32_0 = arith.constant 0 : i32
    %c0_i32_1 = arith.constant 0 : i32
    return %arg0, %c0_i32, %c0_i32_0 : i32, i32, i32
  }
  func.func @transform_1(%arg0: i32) -> (i32, i32) {
    %c0_i32 = arith.constant 0 : i32
    %c0_i32_0 = arith.constant 0 : i32
    %c0_i32_1 = arith.constant 0 : i32
    return %c0_i32, %c0_i32_0 : i32, i32
  }
  func.func @transform_2(%arg0: i32) -> (i32, i32) {
    %c0_i32 = arith.constant 0 : i32
    %c0_i32_0 = arith.constant 0 : i32
    %c0_i32_1 = arith.constant 0 : i32
    return %c0_i32, %c0_i32_0 : i32, i32
  }
  func.func @transform_3(%arg0: i32) -> (i32, i32, i32) {
    %c0_i32 = arith.constant 0 : i32
    %c0_i32_0 = arith.constant 0 : i32
    %c0_i32_1 = arith.constant 0 : i32
    return %arg0, %c0_i32, %c0_i32_0 : i32, i32, i32
  }
  func.func @transform_4(%arg0: i32) -> (i32, i32, i32) {
    %c0_i32 = arith.constant 0 : i32
    %c0_i32_0 = arith.constant 0 : i32
    %c0_i32_1 = arith.constant 0 : i32
    return %arg0, %c0_i32, %c0_i32_0 : i32, i32, i32
  }
  func.func @transform_5(%arg0: i32) -> (i32, i32, i32) {
    %c0_i32 = arith.constant 0 : i32
    %c0_i32_0 = arith.constant 0 : i32
    %c0_i32_1 = arith.constant 0 : i32
    return %arg0, %c0_i32, %c0_i32_0 : i32, i32, i32
  }
  func.func @transform_6(%arg0: i32) -> (i32, i32, i32) {
    %c0_i32 = arith.constant 0 : i32
    %c0_i32_0 = arith.constant 0 : i32
    %c0_i32_1 = arith.constant 0 : i32
    return %arg0, %c0_i32, %c0_i32_0 : i32, i32, i32
  }
}

</mosaic_0001>

<bundles_post_ra>
// kernel: model_forward.1
= control target key start
LH: loop header
LB: loop body
LE: loop exit
PB: predicated region body
PF: predicated region fallthrough
CT: control target
= control target key end

     0   :  { %11 = vsyncpa [#allocation3], 0  ;;  %s2507_s0 = inlined_call_operand.hbm [shape: f32[4,64,64], index: 0, kind: input, shape index: {}]   ;;  %s2508_s1 = inlined_call_operand.hbm [shape: f32[64,64], index: 1, kind: input, shape index: {}]   ;;  %s2509_s2 = inlined_call_operand.vmem [shape: f32[1,64], index: 2, kind: input, shape index: {}]   ;;  %s2510_s3 = inlined_call_operand.vmem [shape: f32[4,8,64], index: 3, kind: input, shape index: {}]   ;;  %s2511_s4 = inlined_call_operand.hbm [shape: f32[4,8,64], index: 4, kind: input, shape index: {}]   ;;  %s2512_s5 = inlined_call_operand.vmem [shape: f32[4,8,64], index: 5, kind: input, shape index: {}]   ;;  %s2513_s6 = inlined_call_operand.hbm [shape: f32[4,64,64], index: 6, kind: output, shape index: {}]  }
   0x1   :  { %12 = vsyncpa [#allocation6], 0 }
   0x2   :  { %13 = vsyncpa [#allocation4], 0  ;;  %s2169_s21 = smov [#allocation5]   ;;  %s2170_s23 = smov [#allocation2]  }
   0x3   :  { %s31_s22 = sshll.u32 %s2169_s21, 4  ;;  %s19_s24 = sshll.u32 %s2170_s23, 4  ;;  %s32_s22 = int_to_ptr.vmem [resolvable:$true] %s31_s22  ;;  %s2213_s24 = int_to_ptr.vmem [resolvable:$true] %s19_s24 }
   0x4   :  { %s2075_s27 = scalar_lea.hbm %s2508_s1, 1024 }
   0x5   :  { %p2076_p0 = scmp.ne.s32.totalorder %s2508_s1, %s2075_s27  ;;  %p2079_p1 = scmp.lt.u32.totalorder %s2075_s27, %s2508_s1 }
   0x7   :  { %p2081_p2 = pnand %p2079_p1, %p2076_p0 }
   0x9   :  { %2084 = shalt.err (!%p2081_p2)
}
   0xa   :  { %s2085_s8 = scalar_lea.vmem %s32_s22, 1024  ;;  %p2090_p4 = scmp.lt.s32.totalorder %s32_s22, %s32_s22 }
   0xb   :  { %p2086_p3 = scmp.ne.s32.totalorder %s32_s22, %s2085_s8  ;;  %p2091_p5 = scmp.lt.s32.totalorder %s2085_s8, %s2085_s8 }
   0xd   :  { %p2092_p6 = por %p2091_p5, %p2090_p4 }
   0xf   :  { %p2093_p7 = pnand %p2092_p6, %p2086_p3 }
  0x11   :  { %2096 = shalt.err (!%p2093_p7)
}
  0x12   :  { %s2171_s9 = smov 128   ;;  %s2172_s10 = smov 8  }
  0x13   :  { %37 = dma.hbm_to_vmem [thread:$0]  %s2508_s1, 1024, %s32_s22, [#allocation6], %s2171_s9, %s2171_s9, %s2172_s10  }
  0x14   :  { %s2097_s15 = scalar_lea.hbm %s2507_s0, 4096 }
  0x15   :  { %p2098_p8 = scmp.ne.s32.totalorder %s2507_s0, %s2097_s15  ;;  %p2101_p9 = scmp.lt.u32.totalorder %s2097_s15, %s2507_s0 }
  0x17   :  { %p2103_p10 = pnand %p2101_p9, %p2098_p8 }
  0x19   :  { %2106 = shalt.err (!%p2103_p10)
}
  0x1a   :  { %s2107_s20 = scalar_lea.vmem %s2213_s24, 4096  ;;  %p2112_p12 = scmp.lt.s32.totalorder %s2213_s24, %s2213_s24 }
  0x1b   :  { %p2108_p11 = scmp.ne.s32.totalorder %s2213_s24, %s2107_s20  ;;  %p2113_p13 = scmp.lt.s32.totalorder %s2107_s20, %s2107_s20 }
  0x1d   :  { %p2114_p0 = por %p2113_p13, %p2112_p12 }
  0x1f   :  { %p2115_p1 = pnand %p2114_p0, %p2108_p11 }
  0x21   :  { %2118 = shalt.err (!%p2115_p1)
}
  0x22   :  { %25 = dma.hbm_to_vmem [thread:$0]  %s2507_s0, 4096, %s2213_s24, [#allocation3], %s2171_s9, %s2171_s9, %s2172_s10  }
  0x23   :  { %s2173_s22 = smov [#allocation7]   ;;  %s2119_s27 = scalar_lea.hbm %s2511_s4, 512 }
  0x24   :  { %s47_s23 = sshll.u32 %s2173_s22, 4  ;;  %p2120_p2 = scmp.ne.s32.totalorder %s2511_s4, %s2119_s27  ;;  %s48_s23 = int_to_ptr.vmem [resolvable:$true] %s47_s23 }
  0x25   :  { %p2123_p3 = scmp.lt.u32.totalorder %s2119_s27, %s2511_s4 }
  0x27   :  { %p2125_p4 = pnand %p2123_p3, %p2120_p2 }
  0x29   :  { %2128 = shalt.err (!%p2125_p4)
}
  0x2a   :  { %s2129_s8 = scalar_lea.vmem %s48_s23, 512  ;;  %p2134_p6 = scmp.lt.s32.totalorder %s48_s23, %s48_s23 }
  0x2b   :  { %p2130_p5 = scmp.ne.s32.totalorder %s48_s23, %s2129_s8  ;;  %p2135_p7 = scmp.lt.s32.totalorder %s2129_s8, %s2129_s8 }
  0x2d   :  { %p2136_p8 = por %p2135_p7, %p2134_p6 }
  0x2f   :  { %p2137_p9 = pnand %p2136_p8, %p2130_p5 }
  0x31   :  { %2140 = shalt.err (!%p2137_p9)
}
  0x32   :  { %53 = dma.hbm_to_vmem [thread:$0]  %s2511_s4, 512, %s48_s23, [#allocation6], %s2171_s9, %s2171_s9, %s2172_s10  }
  0x33   :  { %2163 = dma.done.wait [#allocation3], 4096  }
  0x34   :  { %2164 = vsyncadd [#allocation3], 4294963200 }
  0x35   :  { %2165 = dma.done.wait [#allocation6], 1536  }
  0x36   :  { %2166 = vsyncadd [#allocation6], 4294965760  ;;  %v2174_v0 = vmov 0.0|0.0   ;;  %vm2175_vm0 = vmmov 0   ;;  %v2176_v1 = vmov 0.0   ;;  %v75_v2 = vld [vmem:[#allocation2] sm:$0xff] }
  0x37   :  { %1938 = vmatprep.subr.bf16.mxu0 %v2174_v0  ;;  %1746 = vmatprep.mubr.msk.f32.mxu0 %vm2175_vm0, %v2176_v1  ;;  %v76_v3 = vld [vmem:[#allocation2 + $0x8] sm:$0xff]  ;;  %v77_v4 = vld [vmem:[#allocation2 + $0x10] sm:$0xff]  ;;  %v78_v6 = vld [vmem:[#allocation2 + $0x18] sm:$0xff]  ;;  %vm83_vm1 = vcmask 523264   ;;  %vm319_vm3 = vcmask 64512  }
  0x38   :  { %1950 = vmatprep.subr.bf16.mxu1 %v2174_v0  ;;  %1765 = vmatprep.mubr.msk.f32.mxu1 %vm2175_vm0, %v2176_v1  ;;  %v1939_v5 = vpack.c.bf16 %v76_v3, %v75_v2  ;;  %v1942_v7 = vpack.c.bf16 %v78_v6, %v77_v4  ;;  %v65_v8 = vld [vmem:[#allocation5] sm:$0xff]  ;;  %v66_v9 = vld [vmem:[#allocation5 + $0x8] sm:$0xff]  ;;  %vm2273_vm2 = vmpackc.low %vm83_vm1, %vm83_vm1 }
  0x39   :  { %v79_v11 = vld [vmem:[#allocation2 + $0x20] sm:$0xff]  ;;  %v80_v12 = vld [vmem:[#allocation2 + $0x28] sm:$0xff]  ;;  %v2278_v13 = vpack.c.bf16 %v66_v9, %v65_v8  ;;  %v67_v15 = vld [vmem:[#allocation5 + $0x10] sm:$0xff] }
  0x3a   :  { %1940 = vmatpush3.bf16.msra.mxu0 %v1939_v5  ;;  %v1945_v14 = vpack.c.bf16 %v80_v12, %v79_v11  ;;  %v68_v16 = vld [vmem:[#allocation5 + $0x18] sm:$0xff]  ;;  %v81_v17 = vld [vmem:[#allocation2 + $0x30] sm:$0xff]  ;;  %v74_v21 = vld [vmem:[%s2510_s3] sm:$0xff] }
  0x3b   :  { %1941 = vmatprep.subr.bf16.mxu0 %v2174_v0  ;;  %1953 = vmatpush3.bf16.xpose.msk.msra.mxu1 %vm2273_vm2, %v2278_v13  ;;  %v82_v18 = vld [vmem:[#allocation2 + $0x38] sm:$0xff]  ;;  %v2285_v19 = vpack.c.bf16 %v68_v16, %v67_v15  ;;  %v69_v22 = vld [vmem:[#allocation5 + $0x20] sm:$0xff]  ;;  %v70_v23 = vld [vmem:[#allocation5 + $0x28] sm:$0xff]  ;;  %v157_v28 = vsel %vm83_vm1, %v74_v21, 0.0 }
  0x3c   :  { %1954 = vmatprep.subr.bf16.mxu1 %v2174_v0  ;;  %v1948_v20 = vpack.c.bf16 %v82_v18, %v81_v17  ;;  %v2296_v24 = vpack.c.bf16 %v70_v23, %v69_v22  ;;  %v71_v25 = vld [vmem:[#allocation5 + $0x30] sm:$0xff]  ;;  %v72_v26 = vld [vmem:[#allocation5 + $0x38] sm:$0xff]  ;;  %158 = vadd.xlane.f32.xlu0 %v157_v28  ;;  %v2330_v32 = vld [vmem:[%s2509_s2] ss:$0 sm:$0xff] }
  0x3d   :  { %v2302_v27 = vpack.c.bf16 %v72_v26, %v71_v25  ;;  %v265_v37 = vld [vmem:[%s2512_s5] sm:$0xff]  ;;  %v461_v61 = vld [vmem:[#allocation2 + $0x48] sm:$0xff]  ;;  %v462_v2 = vld [vmem:[#allocation2 + $0x50] sm:$0xff] }
  0x3e   :  { %1943 = vmatpush3.bf16.msra.mxu0 %v1942_v7  ;;  %v286_v59 = vld [vmem:[#allocation7] sm:$0xff]  ;;  %v463_v3 = vld [vmem:[#allocation2 + $0x58] sm:$0xff]  ;;  %v465_v7 = vld [vmem:[#allocation2 + $0x68] sm:$0xff] }
  0x3f   :  { %1944 = vmatprep.subr.bf16.mxu0 %v2174_v0  ;;  %v460_v60 = vld [vmem:[#allocation2 + $0x40] sm:$0xff]  ;;  %v1970_v5 = vpack.c.bf16 %v463_v3, %v462_v2  ;;  %v466_v11 = vld [vmem:[#allocation2 + $0x70] sm:$0xff]  ;;  %v467_v12 = vld [vmem:[#allocation2 + $0x78] sm:$0xff] }
  0x40   :  { %v1967_v63 = vpack.c.bf16 %v461_v61, %v460_v60  ;;  %v464_v6 = vld [vmem:[#allocation2 + $0x60] sm:$0xff]  ;;  %v1976_v15 = vpack.c.bf16 %v467_v12, %v466_v11  ;;  %v817_v3 = vld [vmem:[#allocation2 + $0x88] sm:$0xff] }
  0x41   :  { %v1973_v9 = vpack.c.bf16 %v465_v7, %v464_v6  ;;  %v816_v2 = vld [vmem:[#allocation2 + $0x80] sm:$0xff]  ;;  %v818_v6 = vld [vmem:[#allocation2 + $0x90] sm:$0xff]  ;;  %v819_v7 = vld [vmem:[#allocation2 + $0x98] sm:$0xff] }
  0x42   :  { %1946 = vmatpush3.bf16.msra.mxu0 %v1945_v14  ;;  %v820_v11 = vld [vmem:[#allocation2 + $0xa0] sm:$0xff]  ;;  %v821_v12 = vld [vmem:[#allocation2 + $0xa8] sm:$0xff] }
  0x43   :  { %1947 = vmatprep.subr.bf16.mxu0 %v2174_v0  ;;  %1957 = vmatpush3.bf16.xpose.msk.msra.mxu1 %vm2273_vm2, %v2285_v19 }
  0x44   :  { %1958 = vmatprep.subr.bf16.mxu1 %v2174_v0 }
  0x46   :  { %1949 = vmatpush3.bf16.msra.mxu0 %v1948_v20 }
  0x47   :  { %1768 = vmatprep.subr.mxu0 %v286_v59 }
  0x49   :  { %1747 = vmatmul.mubr.msk.f32.vlgmr.msra.gmra.mrb[0].mxu0 %vm83_vm1, %v74_v21  ;;  %v1562_v21 = vld [vmem:[%s2510_s3 + $0x8] sm:$0xff] }
  0x4a   :  { %1769 = vmatpush3.msra.mxu0 %v286_v59  ;;  %v541_v22 = vsel %vm83_vm1, %v1562_v21, 0.0 }
  0x4b   :  { %1961 = vmatpush3.bf16.xpose.msk.msra.mxu1 %vm2273_vm2, %v2296_v24  ;;  %1966 = vmatprep.subr.bf16.mxu0 %v2174_v0 }
  0x4c   :  { %1962 = vmatprep.subr.bf16.mxu1 %v2174_v0  ;;  %542 = vadd.xlane.f32.xlu1 %v541_v22 }
  0x53   :  { %1965 = vmatpush3.bf16.xpose.msk.msra.mxu1 %vm2273_vm2, %v2302_v27 }
  0x54   :  { %1978 = vmatprep.subr.bf16.mxu1 %v2174_v0 }
  0xc9   :  { %v159_v31 = vpop.xlane.xlu0 %158 }
  0xca   :  { %v166_v33 = vmul.f32 %v2330_v32, %v159_v31 }
 0x11c   :  { %v153_v29 = vpop.f32.mrb[0].mxu0 }
 0x11d   :  { %v1748_v30 = vpop.f32.mrb[1].mxu0  ;;  %1766 = vmatmul.mubr.msk.f32.vlgmr.msra.gmra.mrb[0].mxu1 %vm83_vm1, %v153_v29 }
 0x11e   :  { %1981 = vmatpush3.bf16.xpose.msk.msra.mxu1 %vm2273_vm2, %v2278_v13  ;;  %1817 = vmatprep.mubr.msk.f32.mxu1 %vm2175_vm0, %v2176_v1 }
 0x11f   :  { %1982 = vmatprep.subr.bf16.mxu1 %v2174_v0 }
 0x126   :  { %1985 = vmatpush3.bf16.xpose.msk.msra.mxu1 %vm2273_vm2, %v2285_v19 }
 0x127   :  { %1986 = vmatprep.subr.bf16.mxu1 %v2174_v0 }
 0x12e   :  { %1989 = vmatpush3.bf16.xpose.msk.msra.mxu1 %vm2273_vm2, %v2296_v24 }
 0x12f   :  { %1990 = vmatprep.subr.bf16.mxu1 %v2174_v0 }
 0x136   :  { %1993 = vmatpush3.bf16.xpose.msk.msra.mxu1 %vm2273_vm2, %v2302_v27 }
 0x1f0   :  { %v260_v34 = vpop.f32.mrb[0].mxu1 }
 0x1f1   :  { %v261_v35 = vadd.f32 %v260_v34, %v166_v33  ;;  %v1767_v36 = vpop.f32.mrb[1].mxu1 }
 0x1f2   :  { %v543_v36 = vpop.xlane.xlu1 %542 }
 0x1f3   :  { %v264_v38 = vmul.f32 0.125, %v261_v35 }
 0x1f5   :  { %v266_v39 = vadd.f32 %v265_v37, %v264_v38  ;;  %v544_v37 = vmul.f32 %v2330_v32, %v543_v36 }
 0x1f7   :  { %v267_v40 = vsel %vm83_vm1, %v266_v39, -inf }
 0x1f8   :  { %v268_v41 = vrot.slane %v267_v40, 4 }
 0x1fa   :  { %v269_v42 = vmax.f32 %v267_v40, %v268_v41  ;;  %v1573_v41 = vld [vmem:[%s2512_s5 + $0x8] sm:$0xff] }
 0x1fc   :  { %v270_v43 = vrot.slane %v269_v42, 2 }
 0x1fe   :  { %v271_v44 = vmax.f32 %v269_v42, %v270_v43 }
 0x200   :  { %v272_v45 = vrot.slane %v271_v44, 1 }
 0x202   :  { %v273_v46 = vmax.f32 %v271_v44, %v272_v45 }
 0x204   :  { %v274_v47 = vsub.f32 %v266_v39, %v273_v46 }
 0x206   :  { %v275_v48 = vmul.f32 1.442695, %v274_v47 }
 0x208   :  { %2059 = vpow2.f32 %v275_v48 }
 0x212   :  { %v2060_v49 = vpop.eup %2059 }
 0x213   :  { %v277_v50 = vsel %vm83_vm1, %v2060_v49, 0.0 }
 0x214   :  { %v278_v51 = vrot.slane %v277_v50, 4 }
 0x216   :  { %v279_v52 = vadd.f32 %v278_v51, %v277_v50 }
 0x218   :  { %v280_v53 = vrot.slane %v279_v52, 2 }
 0x21a   :  { %v281_v54 = vadd.f32 %v280_v53, %v279_v52 }
 0x21c   :  { %v282_v55 = vrot.slane %v281_v54, 1 }
 0x21e   :  { %v283_v56 = vadd.f32 %v282_v55, %v281_v54 }
 0x220   :  { %2061 = vrcp.f32 %v283_v56 }
 0x22a   :  { %v2062_v57 = vpop.eup %2061 }
 0x22b   :  { %v285_v58 = vmul.f32 %v2062_v57, %v2060_v49 }
 0x22d   :  { %287 = vxpose.xlu0.b32.start.end [1/1] (short) (narrow) %v285_v58, 64 }
 0x2ad   :  { %v303_v62 = vpop.trf.xlu0 }
 0x2ae   :  { %1770 = vmatprep.mubr.msk.f32.mxu0 %vm319_vm3, %v303_v62 }
 0x2b1   :  { %v304_v4 = vpop.trf.xlu0 }
 0x2b2   :  { %1771 = vmatmul.mubr.msk.f32.vlgmr.msra.gmra.mrb[2].mxu0 %vm319_vm3, %v304_v4 }
 0x2b3   :  { %1968 = vmatpush3.bf16.msra.mxu0 %v1967_v63  ;;  %v642_v63 = vld [vmem:[#allocation7 + $0x8] sm:$0xff] }
 0x2b4   :  { %1969 = vmatprep.subr.bf16.mxu0 %v2174_v0 }
 0x2b5   :  { %v305_v8 = vpop.trf.xlu0 }
 0x2b6   :  { %1773 = vmatprep.mubr.msk.f32.mxu0 %vm319_vm3, %v305_v8 }
 0x2b7   :  { %1971 = vmatpush3.bf16.msra.mxu0 %v1970_v5  ;;  %v1995_v5 = vpack.c.bf16 %v817_v3, %v816_v2 }
 0x2b8   :  { %1972 = vmatprep.subr.bf16.mxu0 %v2174_v0 }
 0x2b9   :  { %v306_v14 = vpop.trf.xlu0 }
 0x2ba   :  { %1774 = vmatmul.mubr.msk.f32.gmra.mrb[4].mxu0 %vm319_vm3, %v306_v14 }
 0x2bb   :  { %1974 = vmatpush3.bf16.msra.mxu0 %v1973_v9  ;;  %v1998_v9 = vpack.c.bf16 %v819_v7, %v818_v6  ;;  %v1172_v6 = vld [vmem:[#allocation2 + $0xc0] sm:$0xff]  ;;  %v1173_v7 = vld [vmem:[#allocation2 + $0xc8] sm:$0xff] }
 0x2bc   :  { %1975 = vmatprep.subr.bf16.mxu0 %v2174_v0 }
 0x2bd   :  { %v307_v16 = vpop.trf.xlu0 }
 0x2be   :  { %1776 = vmatprep.mubr.msk.f32.mxu0 %vm319_vm3, %v307_v16  ;;  %v822_v16 = vld [vmem:[#allocation2 + $0xb0] sm:$0xff] }
 0x2bf   :  { %1977 = vmatpush3.bf16.msra.mxu0 %v1976_v15  ;;  %v2001_v15 = vpack.c.bf16 %v821_v12, %v820_v11  ;;  %v1174_v11 = vld [vmem:[#allocation2 + $0xd0] sm:$0xff]  ;;  %v1175_v12 = vld [vmem:[#allocation2 + $0xd8] sm:$0xff] }
 0x2c0   :  { %1820 = vmatprep.subr.mxu0 %v642_v63 }
 0x2c1   :  { %v308_v17 = vpop.trf.xlu0 }
 0x2c2   :  { %1777 = vmatmul.mubr.msk.f32.gmra.mrb[6].mxu0 %vm319_vm3, %v308_v17  ;;  %v823_v17 = vld [vmem:[#allocation2 + $0xb8] sm:$0xff] }
 0x2c5   :  { %v309_v18 = vpop.trf.xlu0 }
 0x2c6   :  { %1779 = vmatprep.mubr.msk.f32.mxu0 %vm319_vm3, %v309_v18 }
 0x2c9   :  { %v310_v20 = vpop.trf.xlu0 }
 0x2ca   :  { %1780 = vmatmul.mubr.msk.f32.gmra.mrb[8].mxu0 %vm319_vm3, %v310_v20  ;;  %v2004_v20 = vpack.c.bf16 %v823_v17, %v822_v16  ;;  %v1176_v16 = vld [vmem:[#allocation2 + $0xe0] sm:$0xff]  ;;  %v1177_v17 = vld [vmem:[#allocation2 + $0xe8] sm:$0xff] }
 0x2cb   :  { %1798 = vmatprep.mubr.msk.f32.mxu0 %vm2175_vm0, %v2176_v1 }
 0x2ce   :  { %1799 = vmatmul.mubr.msk.f32.vlgmr.msra.gmra.mrb[10].mxu0 %vm83_vm1, %v1562_v21 }
 0x2cf   :  { %1821 = vmatpush3.msra.mxu0 %v642_v63 }
 0x2d0   :  { %1994 = vmatprep.subr.bf16.mxu0 %v2174_v0 }
 0x385   :  { %v1772_v23 = vpop.f32.mrb[2].mxu0 }
 0x386   :  { %450 = vst.msk [vmem:[#allocation8 + $0x8] sm:$0xff] %vm83_vm1, %v1772_v23  ;;  %v410_v25 = vpop.f32.mrb[3].mxu0 }
 0x387   :  { %449 = vst.msk [vmem:[#allocation8] sm:$0xff] %vm83_vm1, %v410_v25 }
 0x38d   :  { %v1775_v26 = vpop.f32.mrb[4].mxu0 }
 0x38e   :  { %452 = vst.msk [vmem:[#allocation8 + $0x18] sm:$0xff] %vm83_vm1, %v1775_v26  ;;  %v420_v28 = vpop.f32.mrb[5].mxu0  ;;  %v1582_v26 = vld [vmem:[%s2510_s3 + $0x10] sm:$0xff] }
 0x38f   :  { %451 = vst.msk [vmem:[#allocation8 + $0x10] sm:$0xff] %vm83_vm1, %v420_v28  ;;  %v897_v28 = vsel %vm83_vm1, %v1582_v26, 0.0 }
 0x390   :  { %898 = vadd.xlane.f32.xlu0 %v897_v28 }
 0x395   :  { %v1778_v29 = vpop.f32.mrb[6].mxu0 }
 0x396   :  { %454 = vst.msk [vmem:[#allocation8 + $0x28] sm:$0xff] %vm83_vm1, %v1778_v29  ;;  %v430_v30 = vpop.f32.mrb[7].mxu0 }
 0x397   :  { %453 = vst.msk [vmem:[#allocation8 + $0x20] sm:$0xff] %vm83_vm1, %v430_v30 }
 0x39d   :  { %v1781_v31 = vpop.f32.mrb[8].mxu0 }
 0x39e   :  { %456 = vst.msk [vmem:[#allocation8 + $0x38] sm:$0xff] %vm83_vm1, %v1781_v31  ;;  %v440_v33 = vpop.f32.mrb[9].mxu0 }
 0x39f   :  { %455 = vst.msk [vmem:[#allocation8 + $0x30] sm:$0xff] %vm83_vm1, %v440_v33 }
 0x3a1   :  { %v537_v34 = vpop.f32.mrb[10].mxu0 }
 0x3a2   :  { %v1800_v35 = vpop.f32.mrb[11].mxu0  ;;  %1818 = vmatmul.mubr.msk.f32.vlgmr.msra.gmra.mrb[2].mxu1 %vm83_vm1, %v537_v34 }
 0x475   :  { %v614_v38 = vpop.f32.mrb[2].mxu1 }
 0x476   :  { %v615_v39 = vadd.f32 %v614_v38, %v544_v37  ;;  %v1819_v40 = vpop.f32.mrb[3].mxu1 }
 0x477   :  { %v899_v40 = vpop.xlane.xlu0 %898 }
 0x478   :  { %v618_v42 = vmul.f32 0.125, %v615_v39 }
 0x47a   :  { %v621_v43 = vadd.f32 %v1573_v41, %v618_v42  ;;  %v900_v41 = vmul.f32 %v2330_v32, %v899_v40 }
 0x47c   :  { %v622_v44 = vsel %vm83_vm1, %v621_v43, -inf }
 0x47d   :  { %v623_v45 = vrot.slane %v622_v44, 4 }
 0x47f   :  { %v624_v46 = vmax.f32 %v622_v44, %v623_v45  ;;  %v1593_v45 = vld [vmem:[%s2512_s5 + $0x10] sm:$0xff] }
 0x481   :  { %v625_v47 = vrot.slane %v624_v46, 2 }
 0x483   :  { %v626_v48 = vmax.f32 %v624_v46, %v625_v47 }
 0x485   :  { %v627_v49 = vrot.slane %v626_v48, 1 }
 0x487   :  { %v628_v50 = vmax.f32 %v626_v48, %v627_v49 }
 0x489   :  { %v629_v51 = vsub.f32 %v621_v43, %v628_v50 }
 0x48b   :  { %v630_v52 = vmul.f32 1.442695, %v629_v51 }
 0x48d   :  { %2063 = vpow2.f32 %v630_v52 }
 0x497   :  { %v2064_v53 = vpop.eup %2063 }
 0x498   :  { %v632_v54 = vsel %vm83_vm1, %v2064_v53, 0.0 }
 0x499   :  { %v633_v55 = vrot.slane %v632_v54, 4 }
 0x49b   :  { %v634_v56 = vadd.f32 %v633_v55, %v632_v54 }
 0x49d   :  { %v635_v57 = vrot.slane %v634_v56, 2 }
 0x49f   :  { %v636_v58 = vadd.f32 %v635_v57, %v634_v56 }
 0x4a1   :  { %v637_v59 = vrot.slane %v636_v58, 1 }
 0x4a3   :  { %v638_v60 = vadd.f32 %v637_v59, %v636_v58 }
 0x4a5   :  { %2065 = vrcp.f32 %v638_v60 }
 0x4af   :  { %v2066_v61 = vpop.eup %2065 }
 0x4b0   :  { %v640_v62 = vmul.f32 %v2066_v61, %v2064_v53 }
 0x4b2   :  { %643 = vxpose.xlu1.b32.start.end [1/1] (short) (narrow) %v640_v62, 64 }
 0x532   :  { %v659_v4 = vpop.trf.xlu1 }
 0x533   :  { %1822 = vmatprep.mubr.msk.f32.mxu0 %vm319_vm3, %v659_v4 }
 0x536   :  { %v660_v8 = vpop.trf.xlu1 }
 0x537   :  { %1823 = vmatmul.mubr.msk.f32.vlgmr.msra.gmra.mrb[12].mxu0 %vm319_vm3, %v660_v8 }
 0x538   :  { %1996 = vmatpush3.bf16.msra.mxu0 %v1995_v5  ;;  %v998_v5 = vld [vmem:[#allocation7 + $0x10] sm:$0xff] }
 0x539   :  { %1997 = vmatprep.subr.bf16.mxu0 %v2174_v0  ;;  %1872 = vmatprep.subr.mxu1 %v998_v5 }
 0x53a   :  { %v661_v14 = vpop.trf.xlu1  ;;  %1873 = vmatpush3.msra.mxu1 %v998_v5 }
 0x53b   :  { %1825 = vmatprep.mubr.msk.f32.mxu0 %vm319_vm3, %v661_v14  ;;  %2022 = vmatprep.subr.bf16.mxu1 %v2174_v0 }
 0x53c   :  { %1999 = vmatpush3.bf16.msra.mxu0 %v1998_v9  ;;  %v2023_v9 = vpack.c.bf16 %v1173_v7, %v1172_v6 }
 0x53d   :  { %2000 = vmatprep.subr.bf16.mxu0 %v2174_v0 }
 0x53e   :  { %v662_v18 = vpop.trf.xlu1 }
 0x53f   :  { %1826 = vmatmul.mubr.msk.f32.gmra.mrb[14].mxu0 %vm319_vm3, %v662_v18 }
 0x540   :  { %2002 = vmatpush3.bf16.msra.mxu0 %v2001_v15  ;;  %v2026_v15 = vpack.c.bf16 %v1175_v12, %v1174_v11 }
 0x541   :  { %2003 = vmatprep.subr.bf16.mxu0 %v2174_v0 }
 0x542   :  { %v663_v21 = vpop.trf.xlu1 }
 0x543   :  { %1828 = vmatprep.mubr.msk.f32.mxu0 %vm319_vm3, %v663_v21  ;;  %v1178_v21 = vld [vmem:[#allocation2 + $0xf0] sm:$0xff] }
 0x544   :  { %2005 = vmatpush3.bf16.msra.mxu0 %v2004_v20  ;;  %v2029_v20 = vpack.c.bf16 %v1177_v17, %v1176_v16 }
 0x545   :  { %2006 = vmatprep.subr.bf16.mxu0 %v2174_v0 }
 0x546   :  { %v664_v22 = vpop.trf.xlu1 }
 0x547   :  { %1829 = vmatmul.mubr.msk.f32.gmra.mrb[16].mxu0 %vm319_vm3, %v664_v22  ;;  %v1179_v22 = vld [vmem:[#allocation2 + $0xf8] sm:$0xff] }
 0x54a   :  { %v665_v23 = vpop.trf.xlu1 }
 0x54b   :  { %1831 = vmatprep.mubr.msk.f32.mxu0 %vm319_vm3, %v665_v23 }
 0x54e   :  { %v666_v25 = vpop.trf.xlu1 }
 0x54f   :  { %1832 = vmatmul.mubr.msk.f32.gmra.mrb[18].mxu0 %vm319_vm3, %v666_v25  ;;  %v2032_v25 = vpack.c.bf16 %v1179_v22, %v1178_v21 }
 0x550   :  { %1850 = vmatprep.mubr.msk.f32.mxu0 %vm2175_vm0, %v2176_v1 }
 0x553   :  { %1851 = vmatmul.mubr.msk.f32.vlgmr.msra.gmra.mrb[20].mxu0 %vm83_vm1, %v1582_v26 }
 0x554   :  { %2009 = vmatpush3.bf16.xpose.msk.msra.mxu0 %vm2273_vm2, %v2278_v13  ;;  %1869 = vmatprep.mubr.msk.f32.mxu0 %vm2175_vm0, %v2176_v1 }
 0x555   :  { %2010 = vmatprep.subr.bf16.mxu0 %v2174_v0 }
 0x55c   :  { %2013 = vmatpush3.bf16.xpose.msk.msra.mxu0 %vm2273_vm2, %v2285_v19 }
 0x55d   :  { %2014 = vmatprep.subr.bf16.mxu0 %v2174_v0 }
 0x564   :  { %2017 = vmatpush3.bf16.xpose.msk.msra.mxu0 %vm2273_vm2, %v2296_v24 }
 0x565   :  { %2018 = vmatprep.subr.bf16.mxu0 %v2174_v0 }
 0x56c   :  { %2021 = vmatpush3.bf16.xpose.msk.msra.mxu0 %vm2273_vm2, %v2302_v27 }
 0x60a   :  { %v1824_v29 = vpop.f32.mrb[12].mxu0 }
 0x60b   :  { %806 = vst.msk [vmem:[#allocation8 + $0x48] sm:$0xff] %vm83_vm1, %v1824_v29  ;;  %v765_v30 = vpop.f32.mrb[13].mxu0 }
 0x60c   :  { %805 = vst.msk [vmem:[#allocation8 + $0x40] sm:$0xff] %vm83_vm1, %v765_v30 }
 0x612   :  { %v1827_v31 = vpop.f32.mrb[14].mxu0 }
 0x613   :  { %808 = vst.msk [vmem:[#allocation8 + $0x58] sm:$0xff] %vm83_vm1, %v1827_v31  ;;  %v775_v33 = vpop.f32.mrb[15].mxu0  ;;  %v1602_v31 = vld [vmem:[%s2510_s3 + $0x18] sm:$0xff] }
 0x614   :  { %807 = vst.msk [vmem:[#allocation8 + $0x50] sm:$0xff] %vm83_vm1, %v775_v33 }
 0x61a   :  { %v1830_v34 = vpop.f32.mrb[16].mxu0 }
 0x61b   :  { %810 = vst.msk [vmem:[#allocation8 + $0x68] sm:$0xff] %vm83_vm1, %v1830_v34  ;;  %v785_v35 = vpop.f32.mrb[17].mxu0 }
 0x61c   :  { %809 = vst.msk [vmem:[#allocation8 + $0x60] sm:$0xff] %vm83_vm1, %v785_v35 }
 0x622   :  { %v1833_v36 = vpop.f32.mrb[18].mxu0 }
 0x623   :  { %812 = vst.msk [vmem:[#allocation8 + $0x78] sm:$0xff] %vm83_vm1, %v1833_v36  ;;  %v795_v37 = vpop.f32.mrb[19].mxu0 }
 0x624   :  { %811 = vst.msk [vmem:[#allocation8 + $0x70] sm:$0xff] %vm83_vm1, %v795_v37 }
 0x626   :  { %v893_v38 = vpop.f32.mrb[20].mxu0 }
 0x627   :  { %v1852_v39 = vpop.f32.mrb[21].mxu0  ;;  %1870 = vmatmul.mubr.msk.f32.vlgmr.msra.gmra.mrb[22].mxu0 %vm83_vm1, %v893_v38 }
 0x6fa   :  { %v970_v42 = vpop.f32.mrb[22].mxu0 }
 0x6fb   :  { %v971_v43 = vadd.f32 %v970_v42, %v900_v41  ;;  %v1871_v44 = vpop.f32.mrb[23].mxu0  ;;  %v1613_v42 = vld [vmem:[%s2512_s5 + $0x18] sm:$0xff]  ;;  %s2177_s5 = smov [#allocation8]  }
 0x6fc   :  { %s1530_s26 = sshll.u32 %s2177_s5, 4  ;;  %s1531_s26 = int_to_ptr.vmem [resolvable:$true] %s1530_s26 }
 0x6fd   :  { %v974_v46 = vmul.f32 0.125, %v971_v43  ;;  %s2141_s27 = scalar_lea.vmem %s1531_s26, 4096  ;;  %p2146_p11 = scmp.lt.s32.totalorder %s1531_s26, %s1531_s26 }
 0x6fe   :  { %p2142_p10 = scmp.ne.s32.totalorder %s1531_s26, %s2141_s27  ;;  %p2147_p12 = scmp.lt.s32.totalorder %s2141_s27, %s2141_s27 }
 0x6ff   :  { %v977_v47 = vadd.f32 %v1593_v45, %v974_v46 }
 0x700   :  { %p2148_p13 = por %p2147_p12, %p2146_p11 }
 0x701   :  { %v978_v48 = vsel %vm83_vm1, %v977_v47, -inf }
 0x702   :  { %v979_v49 = vrot.slane %v978_v48, 4  ;;  %p2149_p0 = pnand %p2148_p13, %p2142_p10 }
 0x704   :  { %v980_v50 = vmax.f32 %v978_v48, %v979_v49 }
 0x706   :  { %v981_v51 = vrot.slane %v980_v50, 2 }
 0x708   :  { %v982_v52 = vmax.f32 %v980_v50, %v981_v51 }
 0x70a   :  { %v983_v53 = vrot.slane %v982_v52, 1 }
 0x70c   :  { %v984_v54 = vmax.f32 %v982_v52, %v983_v53 }
 0x70e   :  { %v985_v55 = vsub.f32 %v977_v47, %v984_v54 }
 0x710   :  { %v986_v56 = vmul.f32 1.442695, %v985_v55 }
 0x712   :  { %2067 = vpow2.f32 %v986_v56 }
 0x71c   :  { %v2068_v57 = vpop.eup %2067 }
 0x71d   :  { %v988_v58 = vsel %vm83_vm1, %v2068_v57, 0.0 }
 0x71e   :  { %v989_v59 = vrot.slane %v988_v58, 4 }
 0x720   :  { %v990_v60 = vadd.f32 %v989_v59, %v988_v58 }
 0x722   :  { %v991_v61 = vrot.slane %v990_v60, 2 }
 0x724   :  { %v992_v62 = vadd.f32 %v991_v61, %v990_v60 }
 0x726   :  { %v993_v63 = vrot.slane %v992_v62, 1 }
 0x728   :  { %v994_v2 = vadd.f32 %v993_v63, %v992_v62  ;;  %v1354_v63 = vld [vmem:[#allocation7 + $0x18] sm:$0xff] }
 0x729   :  { %1924 = vmatprep.subr.mxu0 %v1354_v63 }
 0x72a   :  { %2069 = vrcp.f32 %v994_v2  ;;  %1925 = vmatpush3.msra.mxu0 %v1354_v63 }
 0x734   :  { %v2070_v3 = vpop.eup %2069 }
 0x735   :  { %v996_v4 = vmul.f32 %v2070_v3, %v2068_v57 }
 0x737   :  { %999 = vxpose.xlu1.b32.start.end [1/1] (short) (narrow) %v996_v4, 64 }
 0x7b7   :  { %v1015_v8 = vpop.trf.xlu1 }
 0x7b8   :  { %1874 = vmatprep.mubr.msk.f32.mxu1 %vm319_vm3, %v1015_v8 }
 0x7bb   :  { %v1016_v14 = vpop.trf.xlu1 }
 0x7bc   :  { %1875 = vmatmul.mubr.msk.f32.vlgmr.msra.gmra.mrb[4].mxu1 %vm319_vm3, %v1016_v14 }
 0x7bd   :  { %2024 = vmatpush3.bf16.msra.mxu1 %v2023_v9 }
 0x7be   :  { %2025 = vmatprep.subr.bf16.mxu1 %v2174_v0 }
 0x7bf   :  { %v1017_v18 = vpop.trf.xlu1 }
 0x7c0   :  { %1877 = vmatprep.mubr.msk.f32.mxu1 %vm319_vm3, %v1017_v18 }
 0x7c1   :  { %2027 = vmatpush3.bf16.msra.mxu1 %v2026_v15 }
 0x7c2   :  { %2028 = vmatprep.subr.bf16.mxu1 %v2174_v0 }
 0x7c3   :  { %v1018_v23 = vpop.trf.xlu1 }
 0x7c4   :  { %1878 = vmatmul.mubr.msk.f32.gmra.mrb[6].mxu1 %vm319_vm3, %v1018_v23 }
 0x7c5   :  { %2030 = vmatpush3.bf16.msra.mxu1 %v2029_v20 }
 0x7c6   :  { %2031 = vmatprep.subr.bf16.mxu1 %v2174_v0 }
 0x7c7   :  { %v1019_v26 = vpop.trf.xlu1 }
 0x7c8   :  { %1880 = vmatprep.mubr.msk.f32.mxu1 %vm319_vm3, %v1019_v26 }
 0x7c9   :  { %2033 = vmatpush3.bf16.msra.mxu1 %v2032_v25 }
 0x7ca   :  { %2034 = vmatprep.subr.bf16.mxu1 %v2174_v0 }
 0x7cb   :  { %v1020_v28 = vpop.trf.xlu1 }
 0x7cc   :  { %1881 = vmatmul.mubr.msk.f32.gmra.mrb[8].mxu1 %vm319_vm3, %v1020_v28 }
 0x7cf   :  { %v1021_v29 = vpop.trf.xlu1 }
 0x7d0   :  { %1883 = vmatprep.mubr.msk.f32.mxu1 %vm319_vm3, %v1021_v29 }
 0x7d3   :  { %v1022_v30 = vpop.trf.xlu1 }
 0x7d4   :  { %1884 = vmatmul.mubr.msk.f32.gmra.mrb[10].mxu1 %vm319_vm3, %v1022_v30 }
 0x7d5   :  { %1902 = vmatprep.mubr.msk.f32.mxu1 %vm2175_vm0, %v2176_v1 }
 0x7d8   :  { %1903 = vmatmul.mubr.msk.f32.vlgmr.msra.gmra.mrb[12].mxu1 %vm83_vm1, %v1602_v31 }
 0x7d9   :  { %2037 = vmatpush3.bf16.xpose.msk.msra.mxu1 %vm2273_vm2, %v2278_v13  ;;  %1921 = vmatprep.mubr.msk.f32.mxu1 %vm2175_vm0, %v2176_v1  ;;  %v1253_v1 = vsel %vm83_vm1, %v1602_v31, 0.0 }
 0x7da   :  { %2038 = vmatprep.subr.bf16.mxu1 %v2174_v0  ;;  %1254 = vadd.xlane.f32.xlu1 %v1253_v1 }
 0x7e1   :  { %2041 = vmatpush3.bf16.xpose.msk.msra.mxu1 %vm2273_vm2, %v2285_v19 }
 0x7e2   :  { %2042 = vmatprep.subr.bf16.mxu1 %v2174_v0 }
 0x7e9   :  { %2045 = vmatpush3.bf16.xpose.msk.msra.mxu1 %vm2273_vm2, %v2296_v24 }
 0x7ea   :  { %2046 = vmatprep.subr.bf16.mxu1 %v2174_v0 }
 0x7f1   :  { %2049 = vmatpush3.bf16.xpose.msk.msra.mxu1 %vm2273_vm2, %v2302_v27 }
 0x867   :  { %v1255_v37 = vpop.xlane.xlu1 %1254 }
 0x868   :  { %v1256_v38 = vmul.f32 %v2330_v32, %v1255_v37 }
 0x88f   :  { %v1876_v13 = vpop.f32.mrb[4].mxu1 }
 0x890   :  { %1162 = vst.msk [vmem:[#allocation8 + $0x88] sm:$0xff] %vm83_vm1, %v1876_v13  ;;  %v1121_v33 = vpop.f32.mrb[5].mxu1 }
 0x891   :  { %1161 = vst.msk [vmem:[#allocation8 + $0x80] sm:$0xff] %vm83_vm1, %v1121_v33 }
 0x897   :  { %v1879_v19 = vpop.f32.mrb[6].mxu1 }
 0x898   :  { %1164 = vst.msk [vmem:[#allocation8 + $0x98] sm:$0xff] %vm83_vm1, %v1879_v19  ;;  %v1131_v34 = vpop.f32.mrb[7].mxu1 }
 0x899   :  { %1163 = vst.msk [vmem:[#allocation8 + $0x90] sm:$0xff] %vm83_vm1, %v1131_v34 }
 0x89f   :  { %v1882_v0 = vpop.f32.mrb[8].mxu1 }
 0x8a0   :  { %1166 = vst.msk [vmem:[#allocation8 + $0xa8] sm:$0xff] %vm83_vm1, %v1882_v0  ;;  %v1141_v10 = vpop.f32.mrb[9].mxu1 }
 0x8a1   :  { %1165 = vst.msk [vmem:[#allocation8 + $0xa0] sm:$0xff] %vm83_vm1, %v1141_v10 }
 0x8a7   :  { %v1885_v24 = vpop.f32.mrb[10].mxu1 }
 0x8a8   :  { %1168 = vst.msk [vmem:[#allocation8 + $0xb8] sm:$0xff] %vm83_vm1, %v1885_v24  ;;  %v1151_v27 = vpop.f32.mrb[11].mxu1 }
 0x8a9   :  { %1167 = vst.msk [vmem:[#allocation8 + $0xb0] sm:$0xff] %vm83_vm1, %v1151_v27 }
 0x8ab   :  { %v1249_v35 = vpop.f32.mrb[12].mxu1 }
 0x8ac   :  { %v1904_v36 = vpop.f32.mrb[13].mxu1  ;;  %1922 = vmatmul.mubr.msk.f32.vlgmr.msra.gmra.mrb[14].mxu1 %vm83_vm1, %v1249_v35 }
 0x97f   :  { %v1326_v39 = vpop.f32.mrb[14].mxu1 }
 0x980   :  { %v1327_v40 = vadd.f32 %v1326_v39, %v1256_v38  ;;  %v1923_v41 = vpop.f32.mrb[15].mxu1 }
 0x982   :  { %v1330_v43 = vmul.f32 0.125, %v1327_v40 }
 0x984   :  { %v1333_v44 = vadd.f32 %v1613_v42, %v1330_v43 }
 0x986   :  { %v1334_v45 = vsel %vm83_vm1, %v1333_v44, -inf }
 0x987   :  { %v1335_v46 = vrot.slane %v1334_v45, 4 }
 0x989   :  { %v1336_v47 = vmax.f32 %v1334_v45, %v1335_v46 }
 0x98b   :  { %v1337_v48 = vrot.slane %v1336_v47, 2 }
 0x98d   :  { %v1338_v49 = vmax.f32 %v1336_v47, %v1337_v48 }
 0x98f   :  { %v1339_v50 = vrot.slane %v1338_v49, 1 }
 0x991   :  { %v1340_v51 = vmax.f32 %v1338_v49, %v1339_v50 }
 0x993   :  { %v1341_v52 = vsub.f32 %v1333_v44, %v1340_v51 }
 0x995   :  { %v1342_v53 = vmul.f32 1.442695, %v1341_v52 }
 0x997   :  { %2071 = vpow2.f32 %v1342_v53 }
 0x9a1   :  { %v2072_v32 = vpop.eup %2071 }
 0x9a2   :  { %v1344_v54 = vsel %vm83_vm1, %v2072_v32, 0.0 }
 0x9a3   :  { %v1345_v55 = vrot.slane %v1344_v54, 4 }
 0x9a5   :  { %v1346_v56 = vadd.f32 %v1345_v55, %v1344_v54 }
 0x9a7   :  { %v1347_v57 = vrot.slane %v1346_v56, 2 }
 0x9a9   :  { %v1348_v58 = vadd.f32 %v1347_v57, %v1346_v56 }
 0x9ab   :  { %v1349_v59 = vrot.slane %v1348_v58, 1 }
 0x9ad   :  { %v1350_v60 = vadd.f32 %v1349_v59, %v1348_v58 }
 0x9af   :  { %2073 = vrcp.f32 %v1350_v60 }
 0x9b9   :  { %v2074_v61 = vpop.eup %2073 }
 0x9ba   :  { %v1352_v62 = vmul.f32 %v2074_v61, %v2072_v32 }
 0x9bc   :  { %1355 = vxpose.xlu0.b32.start.end [1/1] (short) (narrow) %v1352_v62, 64 }
 0xa3c   :  { %v1371_v2 = vpop.trf.xlu0 }
 0xa3d   :  { %1926 = vmatprep.mubr.msk.f32.mxu0 %vm319_vm3, %v1371_v2 }
 0xa40   :  { %v1372_v3 = vpop.trf.xlu0 }
 0xa41   :  { %1927 = vmatmul.mubr.msk.f32.vlgmr.msra.gmra.mrb[24].mxu0 %vm319_vm3, %v1372_v3 }
 0xa44   :  { %v1373_v4 = vpop.trf.xlu0 }
 0xa45   :  { %1929 = vmatprep.mubr.msk.f32.mxu0 %vm319_vm3, %v1373_v4 }
 0xa48   :  { %v1374_v5 = vpop.trf.xlu0 }
 0xa49   :  { %1930 = vmatmul.mubr.msk.f32.gmra.mrb[26].mxu0 %vm319_vm3, %v1374_v5 }
 0xa4c   :  { %v1375_v6 = vpop.trf.xlu0 }
 0xa4d   :  { %1932 = vmatprep.mubr.msk.f32.mxu0 %vm319_vm3, %v1375_v6 }
 0xa50   :  { %v1376_v7 = vpop.trf.xlu0 }
 0xa51   :  { %1933 = vmatmul.mubr.msk.f32.gmra.mrb[28].mxu0 %vm319_vm3, %v1376_v7 }
 0xa54   :  { %v1377_v8 = vpop.trf.xlu0 }
 0xa55   :  { %1935 = vmatprep.mubr.msk.f32.mxu0 %vm319_vm3, %v1377_v8 }
 0xa58   :  { %v1378_v9 = vpop.trf.xlu0 }
 0xa59   :  { %1936 = vmatmul.mubr.msk.f32.gmra.mrb[30].mxu0 %vm319_vm3, %v1378_v9 }
 0xb14   :  { %v1928_v11 = vpop.f32.mrb[24].mxu0 }
 0xb15   :  { %1518 = vst.msk [vmem:[#allocation8 + $0xc8] sm:$0xff] %vm83_vm1, %v1928_v11  ;;  %v1477_v12 = vpop.f32.mrb[25].mxu0 }
 0xb16   :  { %1517 = vst.msk [vmem:[#allocation8 + $0xc0] sm:$0xff] %vm83_vm1, %v1477_v12 }
 0xb1c   :  { %v1931_v14 = vpop.f32.mrb[26].mxu0 }
 0xb1d   :  { %1520 = vst.msk [vmem:[#allocation8 + $0xd8] sm:$0xff] %vm83_vm1, %v1931_v14  ;;  %v1487_v15 = vpop.f32.mrb[27].mxu0 }
 0xb1e   :  { %1519 = vst.msk [vmem:[#allocation8 + $0xd0] sm:$0xff] %vm83_vm1, %v1487_v15 }
 0xb24   :  { %v1934_v16 = vpop.f32.mrb[28].mxu0 }
 0xb25   :  { %1522 = vst.msk [vmem:[#allocation8 + $0xe8] sm:$0xff] %vm83_vm1, %v1934_v16  ;;  %v1497_v17 = vpop.f32.mrb[29].mxu0 }
 0xb26   :  { %1521 = vst.msk [vmem:[#allocation8 + $0xe0] sm:$0xff] %vm83_vm1, %v1497_v17 }
 0xb2c   :  { %v1937_v18 = vpop.f32.mrb[30].mxu0 }
 0xb2d   :  { %1524 = vst.msk [vmem:[#allocation8 + $0xf8] sm:$0xff] %vm83_vm1, %v1937_v18  ;;  %v1507_v20 = vpop.f32.mrb[31].mxu0 }
 0xb2e   :  { %1523 = vst.msk [vmem:[#allocation8 + $0xf0] sm:$0xff] %vm83_vm1, %v1507_v20 }
 0xb2f   :  { %2152 = shalt.err (!%p2149_p0)
}
 0xb30   :  { %s2153_s30 = scalar_lea.hbm %s2513_s6, 4096 }
 0xb31   :  { %p2154_p1 = scmp.ne.s32.totalorder %s2513_s6, %s2153_s30  ;;  %p2157_p2 = scmp.lt.u32.totalorder %s2153_s30, %s2513_s6 }
 0xb33   :  { %p2159_p3 = pnand %p2157_p2, %p2154_p1 }
 0xb35   :  { %2162 = shalt.err (!%p2159_p3)
}
 0xb36   :  { %1536 = dma.vmem_to_hbm [thread:$0]  %s1531_s26, 4096, %s2513_s6, [#allocation4], %s2171_s9, %s2171_s9, %s2172_s10  }
 0xb37   :  { %2167 = dma.done.wait [#allocation4], 4096  }
 0xb38   :  { %2168 = vsyncadd [#allocation4], 4294963200 }
 0xb39   :  { %1540 = vsyncpa [#allocation3], 1 }
 0xb3a   :  { %1541 = vsyncpa [#allocation6], 1 }
 0xb3b   :  { %1542 = vsyncpa [#allocation4], 1 }

</bundles_post_ra>
